<compile_context>
chip_gen: v7x
topology: tpu7x:2x2x1
jax: 0.10.0
libtpu: 0.0.40
codegen_flags: <defaults>
</compile_context>

<pallas_src>
import functools

import jax
import jax.numpy as jnp
from jax.experimental import pallas as pl
from jax.experimental.pallas import tpu as pltpu


def _round_up(x, m):
    return ((x + m - 1) // m) * m


def actor_forward_kernel(s_ref, w1p_ref, w2p_ref, whp_ref, out_ref):
    """One batch tile of the fused actor MLP.

    s_ref  : (TM, n_inputs)
    w1p_ref: (n_inputs + 1, n_hidden)      last row = b1
    w2p_ref: (n_hidden + 1, n_hidden)      last row = b2
    whp_ref: (n_hidden + 1, 2*n_actions)   last row = [bmu | blogsigma]
    out_ref: (TM, 2*n_actions)             columns  = [mu | clamp(logsigma)]
    """
    n_in = w1p_ref.shape[0] - 1
    n_hid = w2p_ref.shape[0] - 1
    n_act = whp_ref.shape[1] // 2

    x = s_ref[...]

    # fc1 + ReLU (bias = last row of the packed weight).
    h = jnp.dot(x, w1p_ref[:n_in, :], preferred_element_type=jnp.float32)
    h = jnp.maximum(h + w1p_ref[n_in:n_in + 1, :], 0.0)

    # fc2 + ReLU.
    h = jnp.dot(h, w2p_ref[:n_hid, :], preferred_element_type=jnp.float32)
    h = jnp.maximum(h + w2p_ref[n_hid:n_hid + 1, :], 0.0)

    # Fused heads: one matmul produces [mu | logsigma].
    head = jnp.dot(h, whp_ref[:n_hid, :], preferred_element_type=jnp.float32)
    head = head + whp_ref[n_hid:n_hid + 1, :]

    # Clamp only the logsigma columns to [-20, 2]; mu columns pass through.
    # (iota/compare/select are pure VPU work and free next to the MXU ops.)
    col = jax.lax.broadcasted_iota(jnp.int32, head.shape, 1)
    clamped = jnp.clip(head, -20.0, 2.0)
    out_ref[...] = jnp.where(col >= n_act, clamped, head).astype(out_ref.dtype)


@functools.partial(jax.jit, static_argnames=("tm_max",))
def actor_forward(state, w1p, w2p, whp, *, tm_max=512):
    """Fused SAC-actor forward.  Returns (mu, logsigma), each (B, n_actions)."""
    B, n_in = state.shape
    n_hid = w2p.shape[0] - 1
    n_act2 = whp.shape[1]
    n_act = n_act2 // 2

    # Batch tile: at most tm_max rows, 8-row aligned so multi-step grids
    # respect the (8, 128) block rule.  Pad B up to a multiple of the tile.
    tm = min(tm_max, _round_up(B, 8))
    b_pad = _round_up(B, tm)
    if b_pad != B:
        state = jnp.pad(state, ((0, b_pad - B), (0, 0)))
    grid = (b_pad // tm,)

    flops = 2 * b_pad * (n_in * n_hid + n_hid * n_hid + n_hid * n_act2)
    bytes_accessed = 4 * (b_pad * n_in + w1p.size + w2p.size + whp.size
                          + b_pad * n_act2)

    out = pl.pallas_call(
        actor_forward_kernel,
        out_shape=jax.ShapeDtypeStruct((b_pad, n_act2), jnp.float32),
        grid=grid,
        in_specs=[
            pl.BlockSpec((tm, n_in), lambda i: (i, 0)),           # state tile
            pl.BlockSpec((n_in + 1, n_hid), lambda i: (0, 0)),    # weights stay
            pl.BlockSpec((n_hid + 1, n_hid), lambda i: (0, 0)),   # VMEM-resident
            pl.BlockSpec((n_hid + 1, n_act2), lambda i: (0, 0)),  # across steps
        ],
        out_specs=pl.BlockSpec((tm, n_act2), lambda i: (i, 0)),
        compiler_params=pltpu.CompilerParams(
            dimension_semantics=("parallel",)),
        cost_estimate=pl.CostEstimate(
            flops=flops, transcendentals=0, bytes_accessed=bytes_accessed),
    )(state, w1p, w2p, whp)

    mu = out[:B, :n_act]
    logsigma = out[:B, n_act:]
    return mu, logsigma


def init_params(key, n_inputs, n_hidden, n_actions):
    """Deterministic init mirroring init_layer(): uniform(-sc, sc) with
    sc = 1/sqrt(out_features) for fc1/fc2 and sc = 0.003 for the heads.
    Weights stored as (in, out); biases as (1, out)."""
    ks = jax.random.split(key, 8)

    def u(k, shape, sc):
        return jax.random.uniform(k, shape, jnp.float32, minval=-sc, maxval=sc)

    sc1 = 1.0 / jnp.sqrt(n_hidden)   # PyTorch: weight.size()[0] == out_features
    sc2 = 1.0 / jnp.sqrt(n_hidden)
    sc3 = 0.003
    w1 = u(ks[0], (n_inputs, n_hidden), sc1)
    b1 = u(ks[1], (1, n_hidden), sc1)
    w2 = u(ks[2], (n_hidden, n_hidden), sc2)
    b2 = u(ks[3], (1, n_hidden), sc2)
    wmu = u(ks[4], (n_hidden, n_actions), sc3)
    bmu = u(ks[5], (1, n_actions), sc3)
    wls = u(ks[6], (n_hidden, n_actions), sc3)
    bls = u(ks[7], (1, n_actions), sc3)
    return w1, b1, w2, b2, wmu, bmu, wls, bls


def pack_params(w1, b1, w2, b2, wmu, bmu, wls, bls):
    """Fold biases into the last row of each weight and fuse the two heads.

    Done once outside the kernel (e.g. after each optimizer step), so the
    per-forward cost is just 3 contiguous DMAs of the packed buffers.
    """
    w1p = jnp.concatenate([w1, b1], axis=0)                       # (n_in+1, n_hid)
    w2p = jnp.concatenate([w2, b2], axis=0)                       # (n_hid+1, n_hid)
    wh = jnp.concatenate([wmu, wls], axis=1)                      # (n_hid, 2*n_act)
    bh = jnp.concatenate([bmu, bls], axis=1)                      # (1, 2*n_act)
    whp = jnp.concatenate([wh, bh], axis=0)                       # (n_hid+1, 2*n_act)
    return w1p, w2p, whp


if __name__ == "__main__":
    batch, n_inputs, n_hidden, n_actions = 8, 16, 32, 4

    key = jax.random.PRNGKey(0)
    k_state, k_params, k_state2 = jax.random.split(key, 3)
    state = jax.random.normal(k_state, (batch, n_inputs), jnp.float32)
    params = init_params(k_params, n_inputs, n_hidden, n_actions)
    packed = pack_params(*params)

    mu, logsigma = actor_forward(state, *packed)
    jax.block_until_ready((mu, logsigma))

    # Reference in plain JAX (same math as the PyTorch forward).
    def reference(s):
        w1, b1, w2, b2, wmu, bmu, wls, bls = params
        h = jnp.maximum(s @ w1 + b1, 0.0)
        h = jnp.maximum(h @ w2 + b2, 0.0)
        return h @ wmu + bmu, jnp.clip(h @ wls + bls, -20.0, 2.0)

    mu_r, ls_r = reference(state)
    assert mu.shape == (batch, n_actions) and logsigma.shape == (batch, n_actions)
    assert jnp.allclose(mu, mu_r, atol=1e-5), "mu mismatch"
    assert jnp.allclose(logsigma, ls_r, atol=1e-5), "logsigma mismatch"

    # Exercise the batch-padding / grid path with a non-multiple-of-8 batch.
    state2 = jax.random.normal(k_state2, (10, n_inputs), jnp.float32)
    mu2, ls2 = actor_forward(state2, *packed)
    jax.block_until_ready((mu2, ls2))
    mu2_r, ls2_r = reference(state2)
    assert jnp.allclose(mu2, mu2_r, atol=1e-5), "mu mismatch (padded batch)"
    assert jnp.allclose(ls2, ls2_r, atol=1e-5), "logsigma mismatch (padded batch)"

    print("KERNEL_OK")
</pallas_src>

<mosaic_0001>
module attributes {stable_mosaic.version = 11 : i64} {
  func.func @actor_forward_kernel(%arg0: i32, %arg1: memref<8x16xf32, #tpu.memory_space<vmem>>, %arg2: memref<17x32xf32, #tpu.memory_space<vmem>>, %arg3: memref<33x32xf32, #tpu.memory_space<vmem>>, %arg4: memref<33x8xf32, #tpu.memory_space<vmem>>, %arg5: memref<8x8xf32, #tpu.memory_space<vmem>>) attributes {dimension_semantics = [#tpu.dimension_semantics<parallel>], iteration_bounds = array<i64: 1>, scalar_prefetch = 0 : i64, scratch_operands = 0 : i64, tpu.core_type = #tpu.core_type<tc>, window_params = [{transform_indices = @transform_0, window_bounds = array<i64: 8, 16>}, {pipeline_mode = #tpu.pipeline_mode<synchronous>, transform_indices = @transform_1, window_bounds = array<i64: 17, 32>}, {pipeline_mode = #tpu.pipeline_mode<synchronous>, transform_indices = @transform_2, window_bounds = array<i64: 33, 32>}, {pipeline_mode = #tpu.pipeline_mode<synchronous>, transform_indices = @transform_3, window_bounds = array<i64: 33, 8>}, {transform_indices = @transform_4, window_bounds = array<i64: 8, 8>}]} {
    %c0 = arith.constant 0 : index
    %c0_0 = arith.constant 0 : index
    %0 = vector.load %arg1[%c0, %c0_0] : memref<8x16xf32, #tpu.memory_space<vmem>>, vector<8x16xf32>
    %c0_1 = arith.constant 0 : index
    %c0_2 = arith.constant 0 : index
    %1 = vector.load %arg2[%c0_1, %c0_2] : memref<17x32xf32, #tpu.memory_space<vmem>>, vector<16x32xf32>
    %cst = arith.constant dense<0.000000e+00> : vector<8x32xf32>
    %2 = tpu.matmul %0, %1, %cst {dimension_numbers = #tpu.dot_dimension_numbers<[1], [0], [0], [1], [0, 0, 1, 1], [], []>} : vector<8x16xf32>, vector<16x32xf32>, vector<8x32xf32> -> vector<8x32xf32>
    %c16 = arith.constant 16 : index
    %c0_3 = arith.constant 0 : index
    %3 = vector.load %arg2[%c16, %c0_3] : memref<17x32xf32, #tpu.memory_space<vmem>>, vector<1x32xf32>
    %4 = vector.broadcast %3 : vector<1x32xf32> to vector<8x32xf32>
    %5 = arith.addf %2, %4 : vector<8x32xf32>
    %cst_4 = arith.constant 0.000000e+00 : f32
    %6 = vector.broadcast %cst_4 : f32 to vector<8x32xf32>
    %7 = arith.maximumf %5, %6 : vector<8x32xf32>
    %c0_5 = arith.constant 0 : index
    %c0_6 = arith.constant 0 : index
    %8 = vector.load %arg3[%c0_5, %c0_6] : memref<33x32xf32, #tpu.memory_space<vmem>>, vector<32x32xf32>
    %cst_7 = arith.constant dense<0.000000e+00> : vector<8x32xf32>
    %9 = tpu.matmul %7, %8, %cst_7 {dimension_numbers = #tpu.dot_dimension_numbers<[1], [0], [0], [1], [0, 0, 1, 1], [], []>} : vector<8x32xf32>, vector<32x32xf32>, vector<8x32xf32> -> vector<8x32xf32>
    %c32 = arith.constant 32 : index
    %c0_8 = arith.constant 0 : index
    %10 = vector.load %arg3[%c32, %c0_8] : memref<33x32xf32, #tpu.memory_space<vmem>>, vector<1x32xf32>
    %11 = vector.broadcast %10 : vector<1x32xf32> to vector<8x32xf32>
    %12 = arith.addf %9, %11 : vector<8x32xf32>
    %cst_9 = arith.constant 0.000000e+00 : f32
    %13 = vector.broadcast %cst_9 : f32 to vector<8x32xf32>
    %14 = arith.maximumf %12, %13 : vector<8x32xf32>
    %c0_10 = arith.constant 0 : index
    %c0_11 = arith.constant 0 : index
    %15 = vector.load %arg4[%c0_10, %c0_11] : memref<33x8xf32, #tpu.memory_space<vmem>>, vector<32x8xf32>
    %cst_12 = arith.constant dense<0.000000e+00> : vector<8x8xf32>
    %16 = tpu.matmul %14, %15, %cst_12 {dimension_numbers = #tpu.dot_dimension_numbers<[1], [0], [0], [1], [0, 0, 1, 1], [], []>} : vector<8x32xf32>, vector<32x8xf32>, vector<8x8xf32> -> vector<8x8xf32>
    %c32_13 = arith.constant 32 : index
    %c0_14 = arith.constant 0 : index
    %17 = vector.load %arg4[%c32_13, %c0_14] : memref<33x8xf32, #tpu.memory_space<vmem>>, vector<1x8xf32>
    %18 = vector.broadcast %17 : vector<1x8xf32> to vector<8x8xf32>
    %19 = arith.addf %16, %18 : vector<8x8xf32>
    %20 = tpu.iota {dimensions = array<i32: 1>} : vector<8x8xi32>
    %cst_15 = arith.constant -2.000000e+01 : f32
    %cst_16 = arith.constant 2.000000e+00 : f32
    %21 = vector.broadcast %cst_15 : f32 to vector<8x8xf32>
    %22 = arith.maximumf %21, %19 : vector<8x8xf32>
    %23 = vector.broadcast %cst_16 : f32 to vector<8x8xf32>
    %24 = arith.minimumf %23, %22 : vector<8x8xf32>
    %c4_i32 = arith.constant 4 : i32
    %25 = vector.broadcast %c4_i32 : i32 to vector<8x8xi32>
    %26 = arith.cmpi sge, %20, %25 : vector<8x8xi32>
    %27 = arith.select %26, %24, %19 : vector<8x8xi1>, vector<8x8xf32>
    %c0_17 = arith.constant 0 : index
    %c0_18 = arith.constant 0 : index
    %28 = vector.load %arg5[%c0_17, %c0_18] : memref<8x8xf32, #tpu.memory_space<vmem>>, vector<8x8xf32>
    tpu.vector_store %arg5[%c0_17, %c0_18], %27 {strides = array<i32>} : memref<8x8xf32, #tpu.memory_space<vmem>>, vector<8x8xf32>,
    return
  }
  func.func @transform_0(%arg0: i32) -> (i32, i32) {
    %c0_i32 = arith.constant 0 : i32
    %c0_i32_0 = arith.constant 0 : i32
    return %arg0, %c0_i32 : i32, i32
  }
  func.func @transform_1(%arg0: i32) -> (i32, i32) {
    %c0_i32 = arith.constant 0 : i32
    %c0_i32_0 = arith.constant 0 : i32
    %c0_i32_1 = arith.constant 0 : i32
    return %c0_i32, %c0_i32_0 : i32, i32
  }
  func.func @transform_2(%arg0: i32) -> (i32, i32) {
    %c0_i32 = arith.constant 0 : i32
    %c0_i32_0 = arith.constant 0 : i32
    %c0_i32_1 = arith.constant 0 : i32
    return %c0_i32, %c0_i32_0 : i32, i32
  }
  func.func @transform_3(%arg0: i32) -> (i32, i32) {
    %c0_i32 = arith.constant 0 : i32
    %c0_i32_0 = arith.constant 0 : i32
    %c0_i32_1 = arith.constant 0 : i32
    return %c0_i32, %c0_i32_0 : i32, i32
  }
  func.func @transform_4(%arg0: i32) -> (i32, i32) {
    %c0_i32 = arith.constant 0 : i32
    %c0_i32_0 = arith.constant 0 : i32
    return %arg0, %c0_i32 : i32, i32
  }
}

</mosaic_0001>

<bundles_post_ra>
// kernel: actor_forward.1
= control target key start
LH: loop header
LB: loop body
LE: loop exit
PB: predicated region body
PF: predicated region fallthrough
CT: control target
= control target key end

     0   :  { %v344_v0 = vmov 0.0|0.0   ;;  %vm345_vm0 = vmmov 0   ;;  %v346_v3 = vmov 0.0   ;;  %vm25_vm1 = vcmask 130048   ;;  %s420_s1 = inlined_call_operand.vmem [shape: f32[17,32], index: 1, kind: input, shape index: {}]   ;;  %s421_s2 = inlined_call_operand.vmem [shape: f32[33,32], index: 2, kind: input, shape index: {}]   ;;  %s422_s0 = inlined_call_operand.vmem [shape: f32[8,16], index: 0, kind: input, shape index: {}]   ;;  %s423_s3 = inlined_call_operand.vmem [shape: f32[33,8], index: 3, kind: input, shape index: {}]   ;;  %s424_s4 = inlined_call_operand.vmem [shape: f32[8,8], index: 4, kind: output, shape index: {}]  }
   0x1   :  { %326 = vmatprep.subr.bf16.mxu0 %v344_v0  ;;  %v18_v1 = vld [vmem:[%s420_s1] sm:$0xff]  ;;  %v19_v2 = vld [vmem:[%s420_s1 + $0x8] sm:$0xff]  ;;  %301 = vmatprep.mubr.msk.f32.mxu0 %vm345_vm0, %v346_v3  ;;  %v102_v9 = vld [vmem:[%s421_s2 + $0x10] sm:$0xff]  ;;  %vm109_vm2 = vcmask 261120   ;;  %v266_v28 = vlaneseq  ;;  %vm272_vm4 = vcmask 64512  }
   0x2   :  { %v327_v4 = vpack.c.bf16 %v19_v2, %v18_v1  ;;  %329 = vmatprep.subr.bf16.mxu1 %v344_v0  ;;  %v100_v5 = vld [vmem:[%s421_s2] sm:$0xff]  ;;  %v101_v6 = vld [vmem:[%s421_s2 + $0x8] sm:$0xff]  ;;  %312 = vmatprep.mubr.msk.f32.mxu1 %vm345_vm0, %v346_v3  ;;  %v103_v10 = vld [vmem:[%s421_s2 + $0x18] sm:$0xff] }
   0x3   :  { %v330_v7 = vpack.c.bf16 %v101_v6, %v100_v5  ;;  %v17_v8 = vld [vmem:[%s422_s0] sm:$0xff]  ;;  %v333_v11 = vpack.c.bf16 %v103_v10, %v102_v9  ;;  %v185_v13 = vld [vmem:[%s423_s3 + $0x8] sm:$0xff]  ;;  %v278_v15 = vld [vmem:[%s420_s1 + $0x10] ss:$0 sm:$0xff]  ;;  %v267_v31 = vand.u32 127, %v266_v28 }
   0x4   :  { %328 = vmatpush3.bf16.msra.mxu0 %v327_v4  ;;  %v184_v12 = vld [vmem:[%s423_s3] sm:$0xff]  ;;  %v186_v20 = vld [vmem:[%s423_s3 + $0x10] sm:$0xff]  ;;  %v187_v21 = vld [vmem:[%s423_s3 + $0x18] sm:$0xff] }
   0x5   :  { %331 = vmatpush3.bf16.msra.mxu1 %v330_v7  ;;  %335 = vmatprep.subr.bf16.mxu0 %v344_v0  ;;  %v336_v14 = vpack.c.bf16 %v185_v13, %v184_v12  ;;  %v339_v22 = vpack.c.bf16 %v187_v21, %v186_v20  ;;  %v280_v23 = vld [vmem:[%s421_s2 + $0x20] ss:$0 sm:$0xff]  ;;  %vm270_vm3 = vcmp.ge.s32.totalorder %v267_v31, 4 }
   0x6   :  { %332 = vmatprep.subr.bf16.mxu1 %v344_v0  ;;  %v282_v29 = vld [vmem:[%s423_s3 + $0x20] ss:$0 sm:$0xff] }
   0x7   :  { %302 = vmatmul.mubr.msk.f32.vlgmr.msra.gmra.mrb[0].mxu0 %vm25_vm1, %v17_v8 }
   0x8   :  { %323 = vmatprep.mubr.msk.f32.mxu0 %vm345_vm0, %v346_v3  ;;  %337 = vmatpush3.bf16.msra.mxu0 %v336_v14 }
   0x9   :  { %334 = vmatpush3.bf16.msra.mxu1 %v333_v11  ;;  %338 = vmatprep.subr.bf16.mxu0 %v344_v0 }
   0xc   :  { %340 = vmatpush3.bf16.msra.mxu0 %v339_v22 }
  0xda   :  { %v95_v16 = vpop.f32.mrb[0].mxu0 }
  0xdb   :  { %v96_v17 = vadd.f32 %v278_v15, %v95_v16  ;;  %v303_v18 = vpop.f32.mrb[1].mxu0 }
  0xdd   :  { %v99_v19 = vmax.f32 %v96_v17, 0.0 }
  0xdf   :  { %313 = vmatmul.mubr.msk.f32.vlgmr.msra.gmra.mrb[0].mxu1 %vm109_vm2, %v99_v19 }
 0x1b2   :  { %v179_v24 = vpop.f32.mrb[0].mxu1 }
 0x1b3   :  { %v180_v25 = vadd.f32 %v280_v23, %v179_v24  ;;  %v314_v26 = vpop.f32.mrb[1].mxu1 }
 0x1b5   :  { %v183_v27 = vmax.f32 %v180_v25, 0.0 }
 0x1b7   :  { %324 = vmatmul.mubr.msk.f32.vlgmr.msra.gmra.mrb[2].mxu0 %vm109_vm2, %v183_v27 }
 0x28a   :  { %v262_v30 = vpop.f32.mrb[2].mxu0 }
 0x28b   :  { %v263_v32 = vadd.f32 %v282_v29, %v262_v30  ;;  %v325_v33 = vpop.f32.mrb[3].mxu0 }
 0x28d   :  { %v268_v34 = vmax.f32 %v263_v32, -20.0 }
 0x28f   :  { %v269_v35 = vmin.f32 %v268_v34, 2.0 }
 0x291   :  { %v271_v36 = vsel %vm270_vm3, %v269_v35, %v263_v32 }
 0x292   :  { %273 = vst.msk [vmem:[%s424_s4] sm:$0xff] %vm272_vm4, %v271_v36 }

</bundles_post_ra>
